<compile_context>
chip_gen: v6e
topology: v6e:2x2x1
jax: 0.10.0
libtpu: 0.0.40
codegen_flags: <defaults>
</compile_context>

<pallas_src>
import jax
import jax.numpy as jnp
from jax.experimental import pallas as pl
from jax.experimental.pallas import tpu as pltpu

_LANES = 128        # vreg lane width: keep last dim a multiple of 128
_SUBLANES = 8       # f32 sublane count: keep rows a multiple of 8
_ROW_BLOCK = 2048   # (2048, 128) f32 block = 1 MiB/ref; with double buffering of
                    # one input + one output (~4 MiB live) this fits comfortably
                    # in v7x's 32 MiB scoped / 64 MiB physical VMEM.


def _identity_copy_kernel(*refs):
    """refs = (in_0..in_{n-1}, out_0..out_{n-1}); copy each input to its output."""
    n = len(refs) // 2
    for i in range(n):
        refs[n + i][...] = refs[i][...]


def _to_slab(x):
    """Flatten to a lane-dense (rows, 128) slab (rows padded to a multiple of 8)."""
    n = x.size
    flat = x.reshape(-1)
    pad = (-n) % (_LANES * _SUBLANES)
    if pad:
        flat = jnp.pad(flat, (0, pad))
    return flat.reshape(-1, _LANES), n


def _from_slab(slab, shape, n):
    return slab.reshape(-1)[:n].reshape(shape)


def _copy_slabs_fused(slabs):
    """One pallas_call copying N small slabs (full-array blocks, aliased I/O)."""
    n = len(slabs)
    in_specs = [
        pl.BlockSpec(s.shape, lambda: (0, 0), memory_space=pltpu.MemorySpace.VMEM)
        for s in slabs
    ]
    out_specs = tuple(
        pl.BlockSpec(s.shape, lambda: (0, 0), memory_space=pltpu.MemorySpace.VMEM)
        for s in slabs
    )
    out_shape = tuple(jax.ShapeDtypeStruct(s.shape, s.dtype) for s in slabs)
    out = pl.pallas_call(
        _identity_copy_kernel,
        out_shape=out_shape,
        grid=(),
        in_specs=in_specs,
        out_specs=out_specs,
        input_output_aliases={i: i for i in range(n)},
    )(*slabs)
    return list(out)


def _copy_slab_tiled(slab):
    """Tiled copy for large slabs: (ROW_BLOCK, 128) blocks, parallel grid axis
    so v7x's two TensorCores both issue DMAs."""
    rows = slab.shape[0]
    pad_rows = (-rows) % _ROW_BLOCK
    if pad_rows:
        slab = jnp.pad(slab, ((0, pad_rows), (0, 0)))
    n_blocks = slab.shape[0] // _ROW_BLOCK
    out = pl.pallas_call(
        _identity_copy_kernel,
        out_shape=jax.ShapeDtypeStruct(slab.shape, slab.dtype),
        grid=(n_blocks,),
        in_specs=[pl.BlockSpec((_ROW_BLOCK, _LANES), lambda i: (i, 0),
                               memory_space=pltpu.MemorySpace.VMEM)],
        out_specs=pl.BlockSpec((_ROW_BLOCK, _LANES), lambda i: (i, 0),
                               memory_space=pltpu.MemorySpace.VMEM),
        input_output_aliases={0: 0},
        compiler_params=pltpu.CompilerParams(
            dimension_semantics=("parallel",)),
    )(slab)
    return out[:rows] if pad_rows else out


def cuda_transformer_forward_single(x: jax.Array) -> jax.Array:
    """Pallas equivalent of CUDATransformer.forward for a single tensor."""
    slab, n = _to_slab(x)
    if slab.shape[0] > _ROW_BLOCK:
        out = _copy_slab_tiled(slab)
    else:
        out = _copy_slabs_fused([slab])[0]
    return _from_slab(out, x.shape, n)


def cuda_transformer_forward(x):
    """Mirrors CUDATransformer.forward: identity on a tensor or a dict of
    tensors.  All small dict entries are copied in a single fused pallas_call."""
    if not isinstance(x, dict):
        return cuda_transformer_forward_single(x)

    keys = list(x.keys())
    results = {}
    small_keys, small_slabs, small_meta = [], [], []
    for k in keys:
        v = x[k]
        slab, n = _to_slab(v)
        if slab.shape[0] > _ROW_BLOCK:
            results[k] = _from_slab(_copy_slab_tiled(slab), v.shape, n)
        else:
            small_keys.append(k)
            small_slabs.append(slab)
            small_meta.append((v.shape, n))
    if small_slabs:
        outs = _copy_slabs_fused(small_slabs)
        for k, o, (shape, n) in zip(small_keys, outs, small_meta):
            results[k] = _from_slab(o, shape, n)
    return {k: results[k] for k in keys}


# TODO(synk): .cuda()/.cpu() host<->device transfer semantics (backward()) have
# no Pallas equivalent; only the forward (on-device identity) is implemented.


if __name__ == "__main__":
    key = jax.random.PRNGKey(0)
    x = jax.random.normal(key, (2, 4, 16, 16), dtype=jnp.float32)

    # single-tensor path
    y = jax.block_until_ready(cuda_transformer_forward(x))
    assert y.shape == x.shape and y.dtype == x.dtype
    assert bool(jnp.allclose(y, x))

    # dict path (forward also supports dicts of tensors) -> one fused call
    k1, k2 = jax.random.split(key)
    d = {
        "a": jax.random.normal(k1, (2, 4, 16, 16), dtype=jnp.float32),
        "b": jax.random.normal(k2, (2, 8, 16, 16), dtype=jnp.float32),
    }
    out = jax.block_until_ready(cuda_transformer_forward(d))
    for k in d:
        assert out[k].shape == d[k].shape and out[k].dtype == d[k].dtype
        assert bool(jnp.allclose(out[k], d[k]))

    print("KERNEL_OK")
</pallas_src>

<mosaic_0001>
module attributes {stable_mosaic.version = 11 : i64} {
  func.func @_identity_copy_kernel(%arg0: memref<16x128xf32, #tpu.memory_space<vmem>>, %arg1: memref<16x128xf32, #tpu.memory_space<vmem>>) attributes {dimension_semantics = [], scalar_prefetch = 0 : i64, scratch_operands = 0 : i64, tpu.core_type = #tpu.core_type<tc>} {
    %c0 = arith.constant 0 : index
    %c0_0 = arith.constant 0 : index
    %0 = vector.load %arg0[%c0, %c0_0] : memref<16x128xf32, #tpu.memory_space<vmem>>, vector<16x128xf32>
    %c0_1 = arith.constant 0 : index
    %c0_2 = arith.constant 0 : index
    %1 = vector.load %arg1[%c0_1, %c0_2] : memref<16x128xf32, #tpu.memory_space<vmem>>, vector<16x128xf32>
    tpu.vector_store %arg1[%c0_1, %c0_2], %0 {strides = array<i32>} : memref<16x128xf32, #tpu.memory_space<vmem>>, vector<16x128xf32>,
    return
  }
}

</mosaic_0001>

<bundles_post_ra>
// kernel: tpu_custom_call.1
= control target key start
LH: loop header
LB: loop body
LE: loop exit
PB: predicated region body
PF: predicated region fallthrough
CT: control target
= control target key end

     0   :  { %6 = vsyncpa [#allocation3], 0  ;;  %s112_s0 = inlined_call_operand.hbm [shape: f32[16,128], index: 0, kind: input, shape index: {}, may-alias: {0,1}]   ;;  %s113_s1 = inlined_call_operand.hbm [shape: f32[16,128], index: 1, kind: output, shape index: {}, may-alias: {0,1}]  }
   0x1   :  { %7 = vsyncpa [#allocation4], 0  ;;  %s92_s6 = smov [#allocation2]  }
   0x2   :  { %s13_s7 = sshll.u32 %s92_s6, 4  ;;  %s14_s7 = int_to_ptr.vmem [resolvable:$true] %s13_s7 }
   0x3   :  { %s56_s8 = scalar_lea.vmem %s14_s7, 256  ;;  %p61_p1 = scmp.lt.s32.totalorder %s14_s7, %s14_s7 }
   0x4   :  { %p57_p0 = scmp.ne.s32.totalorder %s14_s7, %s56_s8  ;;  %p62_p2 = scmp.lt.s32.totalorder %s56_s8, %s56_s8 }
   0x6   :  { %p63_p3 = por %p62_p2, %p61_p1 }
   0x8   :  { %p64_p4 = pnand %p63_p3, %p57_p0 }
   0xa   :  { %67 = shalt.err (!%p64_p4)
}
   0xb   :  { %s93_s9 = smov 128   ;;  %s94_s10 = smov 8  }
   0xc   :  { %19 = dma.hbm_to_vmem [thread:$0]  %s112_s0, 256, %s14_s7, [#allocation3], %s93_s9, %s93_s9, %s94_s10  }
   0xd   :  { %88 = dma.done.wait [#allocation3], 256  }
   0xe   :  { %89 = vsyncadd [#allocation3], 4294967040  ;;  %s95_s13 = smov [#allocation5]   ;;  %v23_v0 = vld [vmem:[#allocation2] sm:$0xff]  ;;  %v24_v1 = vld [vmem:[#allocation2 + $0x8] sm:$0xff] }
   0xf   :  { %s32_s14 = sshll.u32 %s95_s13, 4  ;;  %25 = vst [vmem:[#allocation5] sm:$0xff] %v23_v0  ;;  %26 = vst [vmem:[#allocation5 + $0x8] sm:$0xff] %v24_v1  ;;  %s33_s14 = int_to_ptr.vmem [resolvable:$true] %s32_s14 }
  0x10   :  { %s68_s15 = scalar_lea.vmem %s33_s14, 256  ;;  %p73_p6 = scmp.lt.s32.totalorder %s33_s14, %s33_s14 }
  0x11   :  { %p69_p5 = scmp.ne.s32.totalorder %s33_s14, %s68_s15  ;;  %p74_p7 = scmp.lt.s32.totalorder %s68_s15, %s68_s15 }
  0x13   :  { %p75_p8 = por %p74_p7, %p73_p6 }
  0x15   :  { %p76_p9 = pnand %p75_p8, %p69_p5 }
  0x17   :  { %79 = shalt.err (!%p76_p9)
}
  0x18   :  { %38 = dma.vmem_to_hbm [thread:$0]  %s33_s14, 256, %s113_s1, [#allocation4], %s93_s9, %s93_s9, %s94_s10  }
  0x19   :  { %90 = dma.done.wait [#allocation4], 256  }
  0x1a   :  { %91 = vsyncadd [#allocation4], 4294967040 }
  0x1b   :  { %42 = vsyncpa [#allocation3], 1 }
  0x1c   :  { %43 = vsyncpa [#allocation4], 1 }

</bundles_post_ra>
